<compile_context>
chip_gen: v7x
topology: tpu7x:2x2x1
jax: 0.10.0
libtpu: 0.0.40
codegen_flags: <defaults>
</compile_context>

<pallas_src>
import jax
import jax.numpy as jnp
from jax.experimental import pallas as pl
from jax.experimental.pallas import tpu as pltpu


def _rope_kernel(x_ref, cos_ref, sin_ref, o_ref):
    # x_ref / o_ref : (tS, D) tile (batch dim squeezed out by the BlockSpec)
    # cos_ref/sin_ref: (tS, D/2) de-duplicated f32 cache tile
    cos = cos_ref[...]
    sin = sin_ref[...]
    half = cos.shape[-1]

    x = x_ref[...].astype(jnp.float32)
    x1 = x[:, :half]
    x2 = x[:, half:]

    # GPT-NeoX style rotate_half on half-width caches:
    #   out[..., :half] = x1*cos - x2*sin
    #   out[..., half:] = x2*cos + x1*sin
    o_ref[:, :half] = (x1 * cos - x2 * sin).astype(o_ref.dtype)
    o_ref[:, half:] = (x2 * cos + x1 * sin).astype(o_ref.dtype)
    # TODO(synk): if D/2 is not a multiple of 128 at large D (e.g. per-head
    # RoPE with head_dim 64), switch to a pltpu.roll + sign-vector formulation
    # (XLU slot) so the output store is one lane-dense vst instead of two
    # masked half-width stores.


def make_rope_caches(d_model: int, seq_len: int):
    """Deterministic cache construction mirroring the PyTorch __init__, but
    stored de-duplicated as [seq_len, d_model // 2] (float32)."""
    half = d_model // 2
    theta = 10000.0 ** (-jnp.arange(0, half, dtype=jnp.float32) / half)
    seq_idx = jnp.arange(seq_len, dtype=jnp.float32)
    idx_theta = jnp.einsum("n,d->nd", seq_idx, theta)  # [seq_len, D/2]
    return jnp.cos(idx_theta), jnp.sin(idx_theta)


def _round_up(x: int, m: int) -> int:
    return ((x + m - 1) // m) * m


def _default_vmem_limit_bytes() -> int:
    """Size the scoped-VMEM limit off the actual chip: ~70% of physical VMEM,
    capped at 96 MiB.  v5e/v6e (128 MiB) -> ~90 MiB; v7x (64 MiB/TC) -> ~45 MiB."""
    try:
        cap = int(pltpu.get_tpu_info().vmem_capacity_bytes)
    except Exception:
        cap = 128 * 1024 * 1024
    return min(int(cap * 0.7), 96 * 1024 * 1024)


def _choose_seq_tile(S: int, D: int, x_itemsize: int, vmem_limit_bytes: int) -> int:
    """Fixed sequence tile: a multiple of the dtype's sublane packing, capped
    at 1024 rows and at the VMEM budget.  No divisibility requirement on S;
    the grid uses cdiv and Pallas clips the ragged last block."""
    Dh = D // 2
    # x and out double-buffered at width D (I/O dtype); cos+sin double-buffered
    # at width D/2 (f32) -- conservative, cos/sin are actually resident across
    # the inner batch loop.  No extra headroom divisor.
    bytes_per_row = 2 * (2 * D * x_itemsize) + 2 * (2 * Dh * 4)
    max_rows = max(1, vmem_limit_bytes // bytes_per_row)

    # Sublane packing multiple: 8 for f32, 16 for bf16, 32 for int8.
    sub = max(8, (4 // max(1, x_itemsize)) * 8)

    t = min(1024, max_rows, _round_up(S, sub))
    t = max(sub, (t // sub) * sub)
    return t


def rope_forward(x, cos_half, sin_half, *, vmem_limit_bytes=None):
    """x: [B, S, D] (float32 or bfloat16). cos_half/sin_half: [>=S, D/2] f32
    caches.  Returns RoPE(x) in x's dtype."""
    B, S, D = x.shape
    Dh = D // 2
    assert 2 * Dh == D, "d_model must be even for RoPE"
    assert cos_half.shape[0] >= S and sin_half.shape[0] >= S, (
        "cache seq_len must be >= x sequence length")

    if vmem_limit_bytes is None:
        vmem_limit_bytes = _default_vmem_limit_bytes()

    tS = _choose_seq_tile(S, D, jnp.dtype(x.dtype).itemsize, vmem_limit_bytes)
    # B innermost -> cos/sin block index constant over the inner loop (resident).
    grid = (pl.cdiv(S, tS), B)

    # Full (unsliced) caches are passed straight through: the index_map only
    # touches blocks 0 .. cdiv(S, tS)-1, so no wrapper-side slice/copy is paid.
    return pl.pallas_call(
        _rope_kernel,
        out_shape=jax.ShapeDtypeStruct((B, S, D), x.dtype),
        grid=grid,
        in_specs=[
            pl.BlockSpec((None, tS, D), lambda s, b: (b, s, 0)),  # x   -> (tS, D)
            pl.BlockSpec((tS, Dh), lambda s, b: (s, 0)),          # cos -> (tS, D/2)
            pl.BlockSpec((tS, Dh), lambda s, b: (s, 0)),          # sin -> (tS, D/2)
        ],
        out_specs=pl.BlockSpec((None, tS, D), lambda s, b: (b, s, 0)),
        compiler_params=pltpu.CompilerParams(
            dimension_semantics=("parallel", "parallel"),
            vmem_limit_bytes=vmem_limit_bytes,
        ),
    )(x, cos_half, sin_half)


def rope_reference(x, cos_half, sin_half):
    """Plain-JAX reference matching the PyTorch forward exactly
    (reconstructs the duplicated full-width cos/sin caches)."""
    S = x.shape[1]
    cos = jnp.concatenate([cos_half[:S], cos_half[:S]], axis=-1)[None]  # [1,S,D]
    sin = jnp.concatenate([sin_half[:S], sin_half[:S]], axis=-1)[None]
    half = x.shape[-1] // 2
    xf = x.astype(jnp.float32)
    rot = jnp.concatenate([-xf[..., half:], xf[..., :half]], axis=-1)
    return (xf * cos + rot * sin).astype(x.dtype)


if __name__ == "__main__":
    B, S, D = 2, 8, 32          # batch=2, seq=8, d_model=32
    seq_len_cache = 16          # cache built for a longer max seq_len

    cos_half, sin_half = make_rope_caches(D, seq_len_cache)
    key = jax.random.PRNGKey(0)
    x = jax.random.normal(key, (B, S, D), dtype=jnp.float32)

    # f32 path
    out = jax.block_until_ready(rope_forward(x, cos_half, sin_half))
    ref = rope_reference(x, cos_half, sin_half)
    assert out.shape == (B, S, D)
    assert jnp.allclose(out, ref, atol=1e-5, rtol=1e-5)

    # bf16 I/O path (math in f32 inside the kernel)
    x_bf16 = x.astype(jnp.bfloat16)
    out_bf16 = jax.block_until_ready(rope_forward(x_bf16, cos_half, sin_half))
    ref_bf16 = rope_reference(x_bf16, cos_half, sin_half)
    assert out_bf16.dtype == jnp.bfloat16
    assert jnp.allclose(out_bf16.astype(jnp.float32),
                        ref_bf16.astype(jnp.float32), atol=3e-2, rtol=3e-2)

    # Ragged sequence length (S not a multiple of the sublane tile): cdiv grid
    # with a clipped last block, no whole-S fallback.
    S2 = 12
    x2 = jax.random.normal(jax.random.PRNGKey(1), (B, S2, D), dtype=jnp.float32)
    out2 = jax.block_until_ready(rope_forward(x2, cos_half, sin_half))
    ref2 = rope_reference(x2, cos_half, sin_half)
    assert out2.shape == (B, S2, D)
    assert jnp.allclose(out2, ref2, atol=1e-5, rtol=1e-5)

    print("KERNEL_OK")
</pallas_src>

<mosaic_0001>
module attributes {stable_mosaic.version = 11 : i64} {
  func.func @_rope_kernel(%arg0: i32, %arg1: i32, %arg2: memref<1x8x32xf32, #tpu.memory_space<vmem>>, %arg3: memref<8x16xf32, #tpu.memory_space<vmem>>, %arg4: memref<8x16xf32, #tpu.memory_space<vmem>>, %arg5: memref<1x8x32xf32, #tpu.memory_space<vmem>>) attributes {dimension_semantics = [#tpu.dimension_semantics<parallel>, #tpu.dimension_semantics<parallel>], iteration_bounds = array<i64: 1, 2>, scalar_prefetch = 0 : i64, scratch_operands = 0 : i64, tpu.core_type = #tpu.core_type<tc>, window_params = [{transform_indices = @transform_0, window_bounds = array<i64: 1, 8, 32>}, {transform_indices = @transform_1, window_bounds = array<i64: 8, 16>}, {transform_indices = @transform_2, window_bounds = array<i64: 8, 16>}, {transform_indices = @transform_3, window_bounds = array<i64: 1, 8, 32>}]} {
    %c0 = arith.constant 0 : index
    %c0_0 = arith.constant 0 : index
    %0 = vector.load %arg3[%c0, %c0_0] : memref<8x16xf32, #tpu.memory_space<vmem>>, vector<8x16xf32>
    %c0_1 = arith.constant 0 : index
    %c0_2 = arith.constant 0 : index
    %1 = vector.load %arg4[%c0_1, %c0_2] : memref<8x16xf32, #tpu.memory_space<vmem>>, vector<8x16xf32>
    %c0_3 = arith.constant 0 : index
    %c0_4 = arith.constant 0 : index
    %c0_5 = arith.constant 0 : index
    %2 = vector.load %arg2[%c0_3, %c0_4, %c0_5] : memref<1x8x32xf32, #tpu.memory_space<vmem>>, vector<1x8x32xf32>
    %3 = vector.shape_cast %2 : vector<1x8x32xf32> to vector<8x32xf32>
    %4 = vector.extract_strided_slice %3 {offsets = [0, 0], sizes = [8, 16], strides = [1, 1]} : vector<8x32xf32> to vector<8x16xf32>
    %5 = vector.extract_strided_slice %3 {offsets = [0, 16], sizes = [8, 16], strides = [1, 1]} : vector<8x32xf32> to vector<8x16xf32>
    %6 = arith.mulf %4, %0 : vector<8x16xf32>
    %7 = arith.mulf %5, %1 : vector<8x16xf32>
    %8 = arith.subf %6, %7 : vector<8x16xf32>
    %c0_6 = arith.constant 0 : index
    %c0_7 = arith.constant 0 : index
    %c0_8 = arith.constant 0 : index
    %9 = vector.load %arg5[%c0_6, %c0_7, %c0_8] : memref<1x8x32xf32, #tpu.memory_space<vmem>>, vector<1x8x16xf32>
    %10 = vector.shape_cast %9 : vector<1x8x16xf32> to vector<8x16xf32>
    %11 = vector.shape_cast %8 : vector<8x16xf32> to vector<1x8x16xf32>
    tpu.vector_store %arg5[%c0_6, %c0_7, %c0_8], %11 {strides = array<i32>} : memref<1x8x32xf32, #tpu.memory_space<vmem>>, vector<1x8x16xf32>,
    %12 = arith.mulf %5, %0 : vector<8x16xf32>
    %13 = arith.mulf %4, %1 : vector<8x16xf32>
    %14 = arith.addf %12, %13 : vector<8x16xf32>
    %c0_9 = arith.constant 0 : index
    %c0_10 = arith.constant 0 : index
    %c16 = arith.constant 16 : index
    %15 = vector.load %arg5[%c0_9, %c0_10, %c16] : memref<1x8x32xf32, #tpu.memory_space<vmem>>, vector<1x8x16xf32>
    %16 = vector.shape_cast %15 : vector<1x8x16xf32> to vector<8x16xf32>
    %17 = vector.shape_cast %14 : vector<8x16xf32> to vector<1x8x16xf32>
    tpu.vector_store %arg5[%c0_9, %c0_10, %c16], %17 {strides = array<i32>} : memref<1x8x32xf32, #tpu.memory_space<vmem>>, vector<1x8x16xf32>,
    return
  }
  func.func @transform_0(%arg0: i32, %arg1: i32) -> (i32, i32, i32) {
    %c0_i32 = arith.constant 0 : i32
    %c0_i32_0 = arith.constant 0 : i32
    return %arg1, %arg0, %c0_i32 : i32, i32, i32
  }
  func.func @transform_1(%arg0: i32, %arg1: i32) -> (i32, i32) {
    %c0_i32 = arith.constant 0 : i32
    %c0_i32_0 = arith.constant 0 : i32
    return %arg0, %c0_i32 : i32, i32
  }
  func.func @transform_2(%arg0: i32, %arg1: i32) -> (i32, i32) {
    %c0_i32 = arith.constant 0 : i32
    %c0_i32_0 = arith.constant 0 : i32
    return %arg0, %c0_i32 : i32, i32
  }
  func.func @transform_3(%arg0: i32, %arg1: i32) -> (i32, i32, i32) {
    %c0_i32 = arith.constant 0 : i32
    %c0_i32_0 = arith.constant 0 : i32
    return %arg1, %arg0, %c0_i32 : i32, i32, i32
  }
}

</mosaic_0001>

<bundles_post_ra>
// kernel: tpu_custom_call.1
= control target key start
LH: loop header
LB: loop body
LE: loop exit
PB: predicated region body
PF: predicated region fallthrough
CT: control target
= control target key end

     0   :  { %8 = vsyncpa [#allocation3], 0  ;;  %s940_s0 = inlined_call_operand.hbm [shape: f32[2,8,32], index: 0, kind: input, shape index: {}]   ;;  %s941_s1 = inlined_call_operand.hbm [shape: f32[16,16], index: 1, kind: input, shape index: {}]   ;;  %s942_s2 = inlined_call_operand.hbm [shape: f32[16,16], index: 2, kind: input, shape index: {}]   ;;  %s943_s3 = inlined_call_operand.hbm [shape: f32[2,8,32], index: 3, kind: output, shape index: {}]  }
   0x1   :  { %10 = vsyncpa [#allocation3 + $0x1], 0 }
   0x2   :  { %11 = vsyncpa [#allocation6], 0 }
   0x3   :  { %12 = vsyncpa [#allocation4], 0 }
   0x4   :  { %14 = vsyncpa [#allocation4 + $0x1], 0  ;;  %s691_s12 = smov 0   ;;  %s693_s13 = smov 0  }
   0x5   :  { %s695_s14 = smov 0   ;;  %s697_s15 = smov 0  }
   0x6   :  { %s699_s16 = smov 0   ;;  %s701_s17 = smov 0  }
   0x7 LB: > { %s389_s18 = sadd.s32 4294967295, %s663_s17   ;;  %s390_s19 = sadd.s32 4294967294, %s663_s17   ;;  %s663_s17 = sphi %s701_s17, %s20_s17   ;;  %s659_s16 = sphi %s699_s16, %s966_s16   ;;  %s655_s15 = sphi %s697_s15, %s965_s15   ;;  %s651_s14 = sphi %s695_s14, %s964_s14   ;;  %s647_s13 = sphi %s693_s13, %s963_s13   ;;  %s643_s12 = sphi %s691_s12, %s962_s12  }
   0x8   : > { %p54_p0 = scmp.ne.s32.totalorder %s647_s13, %s643_s12  ;;  %p725_p1 = scmp.eq.s32.totalorder %s389_s18, 0 }
   0x9   : > { %p729_p2 = scmp.eq.s32.totalorder %s389_s18, 1  ;;  %p138_p3 = scmp.eq.s32.totalorder %s390_s19, 1 }
   0xa   : > { %s948_s20 = scalar_select %p725_p1, 1, 0 }
   0xb   : > { %s949_s21 = scalar_select %p729_p2, 1, 0 }
   0xc   : > { %p735_p4 = por %p725_p1, %p54_p0  ;;  %p391_p5 = scmp.ge.s32.totalorder %s663_s17, 1 }
   0xd   : > { %p740_p6 = por %p138_p3, %p54_p0  ;;  %p145_p7 = scmp.lt.s32.totalorder %s663_s17, 3 }
   0xe   : > { %s950_s22 = scalar_select %p735_p4, 1, 0 }
   0xf   : > { %s951_s23 = scalar_select %p740_p6, 1, 0 }
  0x10   : > { %p745_p8 = pnand %p391_p5, %p145_p7  ;;  %s665_s25 = smov [#allocation5]  }
  0x11   : > { %s160_s26 = sshll.u32 %s665_s25, 4  ;;  %s666_s27 = smov [#allocation7]   ;;  %s161_s26 = int_to_ptr.vmem [resolvable:$true] %s160_s26 }
  0x12   : > { %s952_s24 = scalar_select %p745_p8, 1, 0 }
  0x13   : > { %p418_p10 = pneg %p745_p8  ;;  %s173_s28 = sshll.u32 %s666_s27, 4  ;;  %s758_s28 = int_to_ptr.vmem [resolvable:$true] %s173_s28 }
  0x14   : > { %s491_s5 = scalar_lea.hbm %s941_s1, 128  ;;  %s496_s10 = scalar_lea.hbm %s941_s1, 256 }
  0x15   : > { %p754_p11 = pnand %p418_p10, %p725_p1  ;;  %p492_p12 = scmp.ne.s32.totalorder %s941_s1, %s491_s5 }
  0x16   : > { %p497_p5 = scmp.lt.u32.totalorder %s496_s10, %s491_s5  ;;  %p498_p7 = scmp.lt.u32.totalorder %s491_s5, %s941_s1 }
  0x17   : > { %p493_p13 = pneg %p754_p11 }
  0x18   : > { %p499_p10 = por %p498_p7, %p497_p5 }
  0x19   : > { %p494_p0 = pnand %p493_p13, %p492_p12 }
  0x1b   : > { %p495_p3 = pneg %p494_p0 }
  0x1d   : > { %p500_p9 = pnand %p499_p10, %p495_p3 }
  0x1f   : > { %503 = shalt.err (!%p500_p9)
}
  0x20   : > { %s504_s19 = scalar_lea.vmem %s161_s26, 128  ;;  %p512_p0 = scmp.lt.s32.totalorder %s161_s26, %s161_s26 }
  0x21   : > { %p505_p6 = scmp.ne.s32.totalorder %s161_s26, %s504_s19  ;;  %p513_p4 = scmp.lt.s32.totalorder %s504_s19, %s504_s19 }
  0x23   : > { %p507_p1 = pnand %p505_p6, %p493_p13  ;;  %p514_p8 = por %p513_p4, %p512_p0 }
  0x25   : > { %p508_p12 = pneg %p507_p1 }
  0x27   : > { %p515_p2 = pnand %p514_p8, %p508_p12 }
  0x29   : > { %518 = shalt.err (!%p515_p2)
}
  0x2a   : > { %421 = dma.hbm_to_vmem [thread:$0]  (!%p754_p11), %s941_s1, 128, %s161_s26, [#allocation6]  }
  0x2b   : > { %s519_s5 = scalar_lea.hbm %s942_s2, 128  ;;  %s524_s10 = scalar_lea.hbm %s942_s2, 256 }
  0x2c   : > { %p520_p1 = scmp.ne.s32.totalorder %s942_s2, %s519_s5  ;;  %p525_p2 = scmp.lt.u32.totalorder %s524_s10, %s519_s5 }
  0x2d   : > { %p526_p8 = scmp.lt.u32.totalorder %s519_s5, %s942_s2 }
  0x2e   : > { %p522_p4 = pnand %p520_p1, %p493_p13 }
  0x2f   : > { %p527_p9 = por %p526_p8, %p525_p2 }
  0x30   : > { %p523_p6 = pneg %p522_p4 }
  0x32   : > { %p528_p3 = pnand %p527_p9, %p523_p6 }
  0x34   : > { %531 = shalt.err (!%p528_p3)
}
  0x35   : > { %s532_s26 = scalar_lea.vmem %s758_s28, 128  ;;  %p540_p12 = scmp.lt.s32.totalorder %s758_s28, %s758_s28 }
  0x36   : > { %p533_p5 = scmp.ne.s32.totalorder %s758_s28, %s532_s26  ;;  %p541_p0 = scmp.lt.s32.totalorder %s532_s26, %s532_s26 }
  0x38   : > { %p535_p7 = pnand %p533_p5, %p493_p13  ;;  %p542_p1 = por %p541_p0, %p540_p12 }
  0x3a   : > { %p536_p10 = pneg %p535_p7 }
  0x3c   : > { %p543_p4 = pnand %p542_p1, %p536_p10 }
  0x3e   : > { %546 = shalt.err (!%p543_p4)
}
  0x3f   : > { %424 = dma.hbm_to_vmem [thread:$0]  (!%p754_p11), %s942_s2, 128, %s758_s28, [#allocation6]  }
  0x40   : > { %s29_s27 = sadd.s32 1, %s659_s16  ;;  %s41_s30 = sadd.s32 1, %s651_s14 }
  0x41   : > { %p30_p13 = scmp.ge.s32.totalorder %s29_s27, 2  ;;  %p48_p6 = scmp.ne.s32.totalorder %s651_s14, %s647_s13 }
  0x42   : > { %p49_p2 = scmp.eq.s32.totalorder %s663_s17, 0  ;;  %p435_p8 = scmp.lt.s32.totalorder %s663_s17, 2 }
  0x43   : > { %s968_s27 = smov (%p30_p13, %s29_s27), 0  ;;  %p954_p3 = scmp.ne.s32.totalorder %s949_s21, 0 }
  0x44   : > { %p50_p9 = por %p49_p2, %p48_p6  ;;  %s36_s4 = ssub.s32 %s659_s16, %s968_s27 }
  0x45   : > { %p823_p5 = por %p954_p3, %p48_p6  ;;  %s184_s5 = sand.u32 1, %s651_s14  }
  0x46   : > { %p39_p7 = scmp.eq.s32.totalorder %s36_s4, 0  ;;  %s395_s28 = sshll.u32 %s184_s5, 3 }
  0x47   : > { %s396_s6 = sshll.u32 %s659_s16, 7  ;;  %s188_s21 = scalar_lea.vmem [#allocation2], %s395_s28 }
  0x48   : > { %s832_s7 = scalar_select %p39_p7, %s651_s14, %s41_s30  }
  0x49   : > { %s837_s10 = scalar_lea.hbm %s940_s0, %s396_s6  ;;  %s196_s11 = sshll.u32 %s188_s21, 4  ;;  %s845_s11 = int_to_ptr.vmem [resolvable:$true] %s196_s11 }
  0x4a   : > { %p841_p11 = pnand %p435_p8, %p50_p9  ;;  %s185_s26 = scalar_lea.sflag [#allocation3], %s184_s5 }
  0x4b   : > { %s547_s19 = scalar_lea.hbm %s837_s10, 128  ;;  %s552_s4 = scalar_lea.hbm %s940_s0, 256 }
  0x4c   : > { %p548_p10 = scmp.ne.s32.totalorder %s837_s10, %s547_s19  ;;  %p549_p12 = pneg %p841_p11 }
  0x4d   : > { %p553_p4 = scmp.lt.u32.totalorder %s837_s10, %s940_s0  ;;  %p554_p13 = scmp.lt.u32.totalorder %s552_s4, %s547_s19 }
  0x4e   : > { %p550_p0 = pnand %p549_p12, %p548_p10  ;;  %p556_p2 = scmp.lt.u32.totalorder %s547_s19, %s837_s10 }
  0x4f   : > { %p555_p6 = por %p554_p13, %p553_p4 }
  0x50   : > { %p551_p1 = pneg %p550_p0 }
  0x51   : > { %p557_p8 = por %p556_p2, %p555_p6 }
  0x53   : > { %p558_p9 = pnand %p557_p8, %p551_p1 }
  0x55   : > { %561 = shalt.err (!%p558_p9)
}
  0x56   : > { %s562_s5 = scalar_lea.vmem %s845_s11, 128  ;;  %s667_s8 = smov [#allocation2]  }
  0x57   : > { %p563_p3 = scmp.ne.s32.totalorder %s845_s11, %s562_s5  ;;  %s567_s9 = sshll.u32 %s667_s8, 4  ;;  %s568_s9 = int_to_ptr.vmem [resolvable:$false] %s567_s9 }
  0x58   : > { %s569_s21 = scalar_lea.vmem %s568_s9, 256  ;;  %p570_p0 = scmp.lt.s32.totalorder %s845_s11, %s568_s9 }
  0x59   : > { %p565_p7 = pnand %p563_p3, %p549_p12  ;;  %p571_p4 = scmp.lt.s32.totalorder %s569_s21, %s562_s5 }
  0x5b   : > { %p566_p10 = pneg %p565_p7  ;;  %p572_p13 = por %p571_p4, %p570_p0 }
  0x5d   : > { %p573_p6 = pnand %p572_p13, %p566_p10 }
  0x5f   : > { %576 = shalt.err (!%p573_p6)
}
  0x60   : > { %428 = dma.hbm_to_vmem [thread:$0]  (!%p841_p11), %s837_s10, 128, %s845_s11, %s185_s26  }
  0x61   : > { %p957_p1 = scmp.ne.s32.totalorder %s952_s24, 0 }
  0x62   : > { %s875_s19 = sand.u32 (!%p957_p1), 1, %s647_s13   ;;  %p958_p12 = scmp.ne.s32.totalorder (!%p957_p1), %s950_s22, 0 }
  0x63   : > { %205 = sbr.rel (%p957_p1) target bundleno = 363 (0x16b), region = 32  ;;  %s398_s25 = sshll.u32 (!%p957_p1), %s875_s19, 3 }
  0x64   : > { %s208_s30 = scalar_lea.sflag (!%p957_p1), [#allocation3], %s875_s19  ;;  %s211_s4 = scalar_lea.vmem (!%p957_p1), [#allocation2], %s398_s25 }
  0x6a   : > { %630 = dma.done.wait (%p958_p12), %s208_s30, 128  }
  0x6b   : > { %632 = vsyncadd (%p958_p12), %s208_s30, 4294967168  ;;  %p959_p2 = scmp.ne.s32.totalorder %s948_s20, 0 }
  0x6d   : > { %634 = dma.done.wait (%p959_p2), [#allocation6], 256  }
  0x6e   : > { %636 = vsyncadd (%p959_p2), [#allocation6], 4294967040  ;;  %v243_v0 = vld [vmem:[#allocation7] sm:$0xff]  ;;  %s668_s24 = smov 16   ;;  %v242_v1 = vld [vmem:[#allocation5] sm:$0xff]  ;;  %s669_s10 = smov 112  }
  0x6f   : > { %247 = vrot.lane.b32.xlu0 %v243_v0, %s668_s24  ;;  %v244_v2 = vld [vmem:[%s211_s4] sm:$0xff]  ;;  %vm256_vm0 = vcmask 130048   ;;  %s403_s20 = sshll.u32 %s655_s15, 7  ;;  %s241_s22 = scalar_lea.vmem [#allocation8], %s398_s25  ;;  %vm269_vm1 = vcmask 261248  }
  0x70   : > { %v263_v5 = vmul.f32 %v244_v2, %v243_v0  ;;  %v245_v6 = vmul.f32 %v244_v2, %v242_v1  ;;  %s286_s11 = sshll.u32 %s241_s22, 4  ;;  %s891_s28 = scalar_lea.hbm %s943_s3, %s403_s20  ;;  %s893_s11 = int_to_ptr.vmem [resolvable:$true] %s286_s11 }
  0x71   : > { %s272_s6 = scalar_lea.sflag [#allocation4], %s875_s19  ;;  %s577_s5 = scalar_lea.vmem %s893_s11, 128 }
  0x72   : > { %p578_p11 = scmp.ne.s32.totalorder %s893_s11, %s577_s5  ;;  %s670_s15 = smov [#allocation8]  }
  0x73   : > { %259 = vrot.lane.b32.xlu0 %v242_v1, %s668_s24  ;;  %s581_s8 = sshll.u32 %s670_s15, 4  ;;  %s582_s8 = int_to_ptr.vmem [resolvable:$false] %s581_s8 }
  0x74   : > { %p579_p8 = pnand %p578_p11, %p823_p5  ;;  %s583_s9 = scalar_lea.vmem %s582_s8, 256 }
  0x75   : > { %p584_p3 = scmp.lt.s32.totalorder %s893_s11, %s582_s8  ;;  %p585_p7 = scmp.lt.s32.totalorder %s583_s9, %s577_s5 }
  0x76   : > { %p580_p9 = pneg %p579_p8 }
  0x77   : > { %p586_p10 = por %p585_p7, %p584_p3 }
  0x79   : > { %p587_p0 = pnand %p586_p10, %p580_p9 }
  0xe1   : > { %v248_v3 = vpop.permute.xlu0 %247 }
  0xe2   : > { %v250_v4 = vmul.f32 %v248_v3, %v244_v2 }
  0xe4   : > { %252 = vrot.lane.b32.xlu1 %v250_v4, %s669_s10 }
  0xe5   : > { %v260_v7 = vpop.permute.xlu0 %259 }
  0xe6   : > { %v262_v10 = vmul.f32 %v260_v7, %v244_v2 }
  0xe8   : > { %265 = vrot.lane.b32.xlu1 %v263_v5, %s668_s24 }
 0x156   : > { %v253_v8 = vpop.permute.xlu1 %252 }
 0x157   : > { %v255_v9 = vsub.f32 %v245_v6, %v253_v8 }
 0x159   : > { %257 = vst.msk [vmem:[%s241_s22] sm:$0xff] %vm256_vm0, %v255_v9 }
 0x15a   : > { %v266_v11 = vpop.permute.xlu1 %265 }
 0x15b   : > { %v268_v12 = vadd.f32 %v266_v11, %v262_v10 }
 0x15d   : > { %270 = vst.msk [vmem:[%s241_s22] sm:$0xff] %vm269_vm1, %v268_v12 }
 0x15e   : > { %590 = shalt.err (!%p587_p0)
}
 0x15f   : > { %s591_s21 = scalar_lea.hbm %s891_s28, 128  ;;  %s595_s30 = scalar_lea.hbm %s943_s3, 256 }
 0x160   : > { %p592_p4 = scmp.ne.s32.totalorder %s891_s28, %s591_s21  ;;  %p596_p1 = scmp.lt.u32.totalorder %s891_s28, %s943_s3 }
 0x161   : > { %p597_p12 = scmp.lt.u32.totalorder %s595_s30, %s591_s21  ;;  %p599_p11 = scmp.lt.u32.totalorder %s591_s21, %s891_s28 }
 0x162   : > { %p593_p13 = pnand %p592_p4, %p823_p5 }
 0x163   : > { %p598_p2 = por %p597_p12, %p596_p1 }
 0x164   : > { %p594_p6 = pneg %p593_p13 }
 0x165   : > { %p600_p8 = por %p599_p11, %p598_p2 }
 0x167   : > { %p601_p9 = pnand %p600_p8, %p594_p6 }
 0x169   : > { %604 = shalt.err (!%p601_p9)
}
 0x16a   : > { %416 = dma.vmem_to_hbm [thread:$0]  (%p823_p5), %s893_s11, 128, %s891_s28, %s272_s6  }
 0x16b PF: > { %s298_s10 = sand.u32 1, %s643_s12   ;;  %p960_p3 = scmp.ne.s32.totalorder %s951_s23, 0 }
 0x16c   : > { %p961_p7 = scmp.ge.s32.totalorder %s663_s17, 2  ;;  %s299_s20 = scalar_lea.sflag [#allocation4], %s298_s10 }
 0x16e   : > { %p430_p10 = pnand %p961_p7, %p960_p3 }
 0x170   : > { %638 = dma.done.wait (!%p430_p10), %s299_s20, 128  }
 0x171   : > { %640 = vsyncadd (!%p430_p10), %s299_s20, 4294967168  ;;  %s20_s17 = sadd.s32 1, %s663_s17   ;;  %s962_s12 = smov %s647_s13 }
 0x172   : > { %p17_p0 = scmp.ge.s32.totalorder %s20_s17, 4   ;;  %s963_s13 = smov %s651_s14 }
 0x173   : > { %s964_s14 = smov %s832_s7  ;;  %s965_s15 = smov %s659_s16 }
 0x174   : > { %s966_s16 = smov %s968_s27  ;;  %19 = sbr.rel (!%p17_p0) target bundleno = 7 (0x7), region = 87 }
 0x17b   :  { %304 = vsyncpa [#allocation3], 1 }
 0x17c   :  { %306 = vsyncpa [#allocation3 + $0x1], 1 }
 0x17d   :  { %307 = vsyncpa [#allocation6], 1 }
 0x17e   :  { %308 = vsyncpa [#allocation4], 1 }
 0x17f   :  { %310 = vsyncpa [#allocation4 + $0x1], 1 }

</bundles_post_ra>
